<compile_context>
chip_gen: v7x
topology: tpu7x:2x2x1
jax: 0.10.0
libtpu: 0.0.40
codegen_flags: <defaults>
</compile_context>

<pallas_src>
import functools

import jax
import jax.numpy as jnp
from jax.experimental import pallas as pl
from jax.experimental.pallas import tpu as pltpu


# ----------------------------- configuration -------------------------------
INPUT_DIM = 64
HIDDEN_DIM = 32
MEMORY_DIM = 64
FULL_OUTPUT_DIM = INPUT_DIM + MEMORY_DIM          # 128  ([new_memory | predicted])
PACKED_DIM = MEMORY_DIM + INPUT_DIM               # 128  ([memory | x])
HIDDEN_PAD = 128                                  # hidden padded to full lane width
FORGET_GATE_INIT = 0.01


# ------------------------------- kernel ------------------------------------
def _titan_kernel(fg_ref, packed_ref, w1_ref, b1_ref, w2_ref, b2_ref,
                  out_ref, surprise_ref, *, memory_dim, input_dim):
    # Scalar forget gate (SMEM) -> sigmoid.
    fg = fg_ref[0]
    forget = 1.0 / (1.0 + jnp.exp(-fg))

    packed = packed_ref[...]                          # (Mb, 128) = [memory | x]
    lane = jax.lax.broadcasted_iota(jnp.int32, packed.shape, 1)

    # Apply the forget gate only on the memory lanes; x lanes pass through.
    gate = jnp.where(lane < memory_dim, 1.0 - forget, 1.0).astype(packed.dtype)
    combined = packed * gate                          # (Mb, 128) = [gated_mem | x]

    # fc1: single K=128 MXU pass (hidden zero-padded to 128 lanes) + ReLU.
    h = jnp.dot(combined, w1_ref[...], preferred_element_type=jnp.float32)
    h = jnp.maximum(h + b1_ref[...], 0.0)             # (Mb, 128)

    # fc2: (Mb, 128) @ (128, 128) -> [new_memory | predicted].
    out = jnp.dot(h, w2_ref[...], preferred_element_type=jnp.float32) + b2_ref[...]
    out_ref[...] = out.astype(out_ref.dtype)          # single lane-dense 128-wide store

    # surprise_i = mean((predicted_i - x_i)^2).  Thanks to the packing,
    # (out - packed) on lanes [memory_dim:) is exactly predicted - x.
    diff = out - packed
    sq = jnp.where(lane >= memory_dim, diff * diff, 0.0)
    surprise_ref[...] = (jnp.sum(sq, axis=-1, keepdims=True)
                         * (1.0 / float(input_dim))).astype(surprise_ref.dtype)


# ------------------------------ wrapper -------------------------------------
@functools.partial(jax.jit, static_argnames=("block_m",))
def titan_forward(forget_gate, x, memory, w1, b1, w2, b2, block_m=128):
    """Batched Pallas forward pass.

    Args:
      forget_gate: (1,) f32 scalar parameter
      x:           (M, INPUT_DIM)  f32
      memory:      (M, MEMORY_DIM) f32
      w1:          (INPUT_DIM + MEMORY_DIM, HIDDEN_DIM) f32  (fc1 weight, transposed,
                   rows ordered for concat([x, gated_memory]) like the PyTorch module)
      b1:          (1, HIDDEN_DIM) f32
      w2:          (HIDDEN_DIM, FULL_OUTPUT_DIM) f32         (fc2 weight, transposed)
      b2:          (1, FULL_OUTPUT_DIM) f32

    Returns:
      dict with 'predicted' (M, INPUT_DIM), 'new_memory' (M, MEMORY_DIM),
      'surprise' (M, 1)  (per-row mean squared prediction error).
    """
    m = x.shape[0]

    # Lane-dense packing: [memory | x] -> 128 lanes per row.
    packed = jnp.concatenate([memory, x], axis=-1).astype(jnp.float32)   # (M, 128)

    # Re-layout weights once (fused by XLA, negligible):
    #  - w1 rows reordered from [x rows ; memory rows] to [memory rows ; x rows]
    #    to match the [memory | x] packing,
    #  - hidden dim zero-padded 32 -> 128 so all matmuls are full lane width.
    w1_r = jnp.concatenate([w1[INPUT_DIM:, :], w1[:INPUT_DIM, :]], axis=0)
    w1_p = jnp.pad(w1_r, ((0, 0), (0, HIDDEN_PAD - HIDDEN_DIM)))          # (128, 128)
    b1_p = jnp.pad(b1.reshape(1, HIDDEN_DIM),
                   ((0, 0), (0, HIDDEN_PAD - HIDDEN_DIM)))                # (1, 128)
    w2_p = jnp.pad(w2, ((0, HIDDEN_PAD - HIDDEN_DIM), (0, 0)))            # (128, 128)
    b2_p = b2.reshape(1, FULL_OUTPUT_DIM)                                 # (1, 128)

    # Pad the row count up to a multiple of the M block; padded rows are
    # sliced off before returning.
    num_blocks = pl.cdiv(m, block_m)
    m_pad = num_blocks * block_m
    if m_pad != m:
        packed = jnp.pad(packed, ((0, m_pad - m), (0, 0)))

    kernel = functools.partial(_titan_kernel,
                               memory_dim=MEMORY_DIM, input_dim=INPUT_DIM)

    smem = pltpu.MemorySpace.SMEM

    out_full, surprise = pl.pallas_call(
        kernel,
        grid=(num_blocks,),
        out_shape=(
            jax.ShapeDtypeStruct((m_pad, FULL_OUTPUT_DIM), jnp.float32),  # [new_mem|pred]
            jax.ShapeDtypeStruct((m_pad, 1), jnp.float32),                # per-row surprise
        ),
        in_specs=[
            pl.BlockSpec(memory_space=smem),                              # forget_gate scalar
            pl.BlockSpec((block_m, PACKED_DIM), lambda i: (i, 0)),        # packed rows (streamed)
            pl.BlockSpec((PACKED_DIM, HIDDEN_PAD), lambda i: (0, 0)),     # w1 (resident)
            pl.BlockSpec((1, HIDDEN_PAD), lambda i: (0, 0)),              # b1 (resident)
            pl.BlockSpec((HIDDEN_PAD, FULL_OUTPUT_DIM), lambda i: (0, 0)),# w2 (resident)
            pl.BlockSpec((1, FULL_OUTPUT_DIM), lambda i: (0, 0)),         # b2 (resident)
        ],
        out_specs=(
            pl.BlockSpec((block_m, FULL_OUTPUT_DIM), lambda i: (i, 0)),
            pl.BlockSpec((block_m, 1), lambda i: (i, 0)),
        ),
        compiler_params=pltpu.CompilerParams(
            dimension_semantics=("parallel",)),   # lets v7x shard blocks across its 2 TCs
    )(forget_gate, packed, w1_p, b1_p, w2_p, b2_p)

    out_full = out_full[:m]
    surprise = surprise[:m]
    return {
        "predicted": out_full[:, MEMORY_DIM:],   # free XLA slices of the packed output
        "new_memory": out_full[:, :MEMORY_DIM],
        "surprise": surprise,
    }


# ------------------------- reference (pure JAX) ------------------------------
def titan_forward_ref(forget_gate, x, memory, w1, b1, w2, b2):
    forget = jax.nn.sigmoid(forget_gate[0])
    gated = memory * (1.0 - forget)
    combined = jnp.concatenate([x, gated], axis=-1)
    h = jax.nn.relu(combined @ w1 + b1)
    out = h @ w2 + b2
    new_memory = out[:, :MEMORY_DIM]
    predicted = out[:, MEMORY_DIM:]
    diff = predicted - x
    surprise = jnp.mean(diff * diff, axis=-1, keepdims=True)
    return {"predicted": predicted, "new_memory": new_memory, "surprise": surprise}


# --------------------------------- main --------------------------------------
if __name__ == "__main__":
    key = jax.random.PRNGKey(0)
    k_x, k_mem, k_w1, k_b1, k_w2, k_b2 = jax.random.split(key, 6)

    # Batch of rows processed in one call (2 grid blocks of 128 rows).
    M = 256

    # Deterministic synthetic parameters (shapes match nn.Linear in __init__).
    scale1 = 1.0 / jnp.sqrt(jnp.float32(INPUT_DIM + MEMORY_DIM))
    scale2 = 1.0 / jnp.sqrt(jnp.float32(HIDDEN_DIM))
    w1 = jax.random.uniform(k_w1, (INPUT_DIM + MEMORY_DIM, HIDDEN_DIM),
                            jnp.float32, -scale1, scale1)
    b1 = jax.random.uniform(k_b1, (1, HIDDEN_DIM), jnp.float32, -scale1, scale1)
    w2 = jax.random.uniform(k_w2, (HIDDEN_DIM, FULL_OUTPUT_DIM),
                            jnp.float32, -scale2, scale2)
    b2 = jax.random.uniform(k_b2, (1, FULL_OUTPUT_DIM), jnp.float32, -scale2, scale2)
    forget_gate = jnp.array([FORGET_GATE_INIT], dtype=jnp.float32)

    # Example inputs: a batch of x rows and memory states (reset_memory -> zeros;
    # random here to exercise the gating path too).
    x = jax.random.normal(k_x, (M, INPUT_DIM), jnp.float32)
    memory = jax.random.normal(k_mem, (M, MEMORY_DIM), jnp.float32)

    out = titan_forward(forget_gate, x, memory, w1, b1, w2, b2)
    jax.block_until_ready(out)

    ref = titan_forward_ref(forget_gate, x, memory, w1, b1, w2, b2)
    assert out["predicted"].shape == (M, INPUT_DIM)
    assert out["new_memory"].shape == (M, MEMORY_DIM)
    assert out["surprise"].shape == (M, 1)
    assert jnp.allclose(out["predicted"], ref["predicted"], atol=1e-4)
    assert jnp.allclose(out["new_memory"], ref["new_memory"], atol=1e-4)
    assert jnp.allclose(out["surprise"], ref["surprise"], atol=1e-4)

    print("KERNEL_OK")
</pallas_src>

<mosaic_0001>
module attributes {stable_mosaic.version = 11 : i64} {
  func.func @_titan_kernel(%arg0: i32, %arg1: memref<1xf32, #tpu.memory_space<smem>>, %arg2: memref<128x128xf32, #tpu.memory_space<vmem>>, %arg3: memref<128x128xf32, #tpu.memory_space<vmem>>, %arg4: memref<1x128xf32, #tpu.memory_space<vmem>>, %arg5: memref<128x128xf32, #tpu.memory_space<vmem>>, %arg6: memref<1x128xf32, #tpu.memory_space<vmem>>, %arg7: memref<128x128xf32, #tpu.memory_space<vmem>>, %arg8: memref<128x1xf32, #tpu.memory_space<vmem>>) attributes {dimension_semantics = [#tpu.dimension_semantics<parallel>], iteration_bounds = array<i64: 2>, scalar_prefetch = 0 : i64, scratch_operands = 0 : i64, tpu.core_type = #tpu.core_type<tc>, window_params = [{transform_indices = @transform_0, window_bounds = array<i64: 1>}, {transform_indices = @transform_1, window_bounds = array<i64: 128, 128>}, {pipeline_mode = #tpu.pipeline_mode<synchronous>, transform_indices = @transform_2, window_bounds = array<i64: 128, 128>}, {pipeline_mode = #tpu.pipeline_mode<synchronous>, transform_indices = @transform_3, window_bounds = array<i64: 1, 128>}, {pipeline_mode = #tpu.pipeline_mode<synchronous>, transform_indices = @transform_4, window_bounds = array<i64: 128, 128>}, {pipeline_mode = #tpu.pipeline_mode<synchronous>, transform_indices = @transform_5, window_bounds = array<i64: 1, 128>}, {transform_indices = @transform_6, window_bounds = array<i64: 128, 128>}, {transform_indices = @transform_7, window_bounds = array<i64: 128, 1>}]} {
    %c0 = arith.constant 0 : index
    %0 = memref.load %arg1[%c0] : memref<1xf32, #tpu.memory_space<smem>>
    %cst = arith.constant 0.000000e+00 : f32
    %1 = arith.subf %cst, %0 : f32
    %2 = math.exp %1 : f32
    %cst_0 = arith.constant 1.000000e+00 : f32
    %3 = arith.addf %cst_0, %2 : f32
    %cst_1 = arith.constant 1.000000e+00 : f32
    %4 = arith.divf %cst_1, %3 : f32
    %c0_2 = arith.constant 0 : index
    %c0_3 = arith.constant 0 : index
    %5 = vector.load %arg2[%c0_2, %c0_3] : memref<128x128xf32, #tpu.memory_space<vmem>>, vector<128x128xf32>
    %6 = tpu.iota {dimensions = array<i32: 1>} : vector<128x128xi32>
    %c64_i32 = arith.constant 64 : i32
    %7 = vector.broadcast %c64_i32 : i32 to vector<128x128xi32>
    %8 = arith.cmpi slt, %6, %7 : vector<128x128xi32>
    %cst_4 = arith.constant 1.000000e+00 : f32
    %9 = arith.subf %cst_4, %4 : f32
    %cst_5 = arith.constant 1.000000e+00 : f32
    %10 = vector.broadcast %9 : f32 to vector<128x128xf32>
    %11 = vector.broadcast %cst_5 : f32 to vector<128x128xf32>
    %12 = arith.select %8, %10, %11 : vector<128x128xi1>, vector<128x128xf32>
    %13 = arith.mulf %5, %12 : vector<128x128xf32>
    %c0_6 = arith.constant 0 : index
    %c0_7 = arith.constant 0 : index
    %14 = vector.load %arg3[%c0_6, %c0_7] : memref<128x128xf32, #tpu.memory_space<vmem>>, vector<128x128xf32>
    %cst_8 = arith.constant dense<0.000000e+00> : vector<128x128xf32>
    %15 = tpu.matmul %13, %14, %cst_8 {dimension_numbers = #tpu.dot_dimension_numbers<[1], [0], [0], [1], [0, 0, 1, 1], [], []>} : vector<128x128xf32>, vector<128x128xf32>, vector<128x128xf32> -> vector<128x128xf32>
    %c0_9 = arith.constant 0 : index
    %c0_10 = arith.constant 0 : index
    %16 = vector.load %arg4[%c0_9, %c0_10] : memref<1x128xf32, #tpu.memory_space<vmem>>, vector<1x128xf32>
    %17 = vector.broadcast %16 : vector<1x128xf32> to vector<128x128xf32>
    %18 = arith.addf %15, %17 : vector<128x128xf32>
    %cst_11 = arith.constant 0.000000e+00 : f32
    %19 = vector.broadcast %cst_11 : f32 to vector<128x128xf32>
    %20 = arith.maximumf %18, %19 : vector<128x128xf32>
    %c0_12 = arith.constant 0 : index
    %c0_13 = arith.constant 0 : index
    %21 = vector.load %arg5[%c0_12, %c0_13] : memref<128x128xf32, #tpu.memory_space<vmem>>, vector<128x128xf32>
    %cst_14 = arith.constant dense<0.000000e+00> : vector<128x128xf32>
    %22 = tpu.matmul %20, %21, %cst_14 {dimension_numbers = #tpu.dot_dimension_numbers<[1], [0], [0], [1], [0, 0, 1, 1], [], []>} : vector<128x128xf32>, vector<128x128xf32>, vector<128x128xf32> -> vector<128x128xf32>
    %c0_15 = arith.constant 0 : index
    %c0_16 = arith.constant 0 : index
    %23 = vector.load %arg6[%c0_15, %c0_16] : memref<1x128xf32, #tpu.memory_space<vmem>>, vector<1x128xf32>
    %24 = vector.broadcast %23 : vector<1x128xf32> to vector<128x128xf32>
    %25 = arith.addf %22, %24 : vector<128x128xf32>
    %c0_17 = arith.constant 0 : index
    %c0_18 = arith.constant 0 : index
    %26 = vector.load %arg7[%c0_17, %c0_18] : memref<128x128xf32, #tpu.memory_space<vmem>>, vector<128x128xf32>
    tpu.vector_store %arg7[%c0_17, %c0_18], %25 {strides = array<i32>} : memref<128x128xf32, #tpu.memory_space<vmem>>, vector<128x128xf32>,
    %27 = arith.subf %25, %5 : vector<128x128xf32>
    %c64_i32_19 = arith.constant 64 : i32
    %28 = vector.broadcast %c64_i32_19 : i32 to vector<128x128xi32>
    %29 = arith.cmpi sge, %6, %28 : vector<128x128xi32>
    %30 = arith.mulf %27, %27 : vector<128x128xf32>
    %cst_20 = arith.constant 0.000000e+00 : f32
    %31 = vector.broadcast %cst_20 : f32 to vector<128x128xf32>
    %32 = arith.select %29, %30, %31 : vector<128x128xi1>, vector<128x128xf32>
    %cst_21 = arith.constant dense<0.000000e+00> : vector<128xf32>
    %33 = vector.multi_reduction <add>, %32, %cst_21 [1] : vector<128x128xf32> to vector<128xf32>
    %34 = vector.shape_cast %33 : vector<128xf32> to vector<128x1xf32>
    %cst_22 = arith.constant 1.562500e-02 : f32
    %35 = vector.broadcast %cst_22 : f32 to vector<128x1xf32>
    %36 = arith.mulf %34, %35 : vector<128x1xf32>
    %c0_23 = arith.constant 0 : index
    %c0_24 = arith.constant 0 : index
    %37 = vector.load %arg8[%c0_23, %c0_24] : memref<128x1xf32, #tpu.memory_space<vmem>>, vector<128x1xf32>
    tpu.vector_store %arg8[%c0_23, %c0_24], %36 {strides = array<i32>} : memref<128x1xf32, #tpu.memory_space<vmem>>, vector<128x1xf32>,
    return
  }
  func.func @transform_0(%arg0: i32) -> i32 {
    %c0_i32 = arith.constant 0 : i32
    %c0_i32_0 = arith.constant 0 : i32
    return %c0_i32 : i32
  }
  func.func @transform_1(%arg0: i32) -> (i32, i32) {
    %c0_i32 = arith.constant 0 : i32
    %c0_i32_0 = arith.constant 0 : i32
    return %arg0, %c0_i32 : i32, i32
  }
  func.func @transform_2(%arg0: i32) -> (i32, i32) {
    %c0_i32 = arith.constant 0 : i32
    %c0_i32_0 = arith.constant 0 : i32
    %c0_i32_1 = arith.constant 0 : i32
    return %c0_i32, %c0_i32_0 : i32, i32
  }
  func.func @transform_3(%arg0: i32) -> (i32, i32) {
    %c0_i32 = arith.constant 0 : i32
    %c0_i32_0 = arith.constant 0 : i32
    %c0_i32_1 = arith.constant 0 : i32
    return %c0_i32, %c0_i32_0 : i32, i32
  }
  func.func @transform_4(%arg0: i32) -> (i32, i32) {
    %c0_i32 = arith.constant 0 : i32
    %c0_i32_0 = arith.constant 0 : i32
    %c0_i32_1 = arith.constant 0 : i32
    return %c0_i32, %c0_i32_0 : i32, i32
  }
  func.func @transform_5(%arg0: i32) -> (i32, i32) {
    %c0_i32 = arith.constant 0 : i32
    %c0_i32_0 = arith.constant 0 : i32
    %c0_i32_1 = arith.constant 0 : i32
    return %c0_i32, %c0_i32_0 : i32, i32
  }
  func.func @transform_6(%arg0: i32) -> (i32, i32) {
    %c0_i32 = arith.constant 0 : i32
    %c0_i32_0 = arith.constant 0 : i32
    return %arg0, %c0_i32 : i32, i32
  }
  func.func @transform_7(%arg0: i32) -> (i32, i32) {
    %c0_i32 = arith.constant 0 : i32
    %c0_i32_0 = arith.constant 0 : i32
    return %arg0, %c0_i32 : i32, i32
  }
}

</mosaic_0001>

<bundles_post_ra>
// kernel: titan_forward.1
= control target key start
LH: loop header
LB: loop body
LE: loop exit
PB: predicated region body
PF: predicated region fallthrough
CT: control target
= control target key end

     0   :  { %s1239_s26 = smov 0   ;;  %s1556_s0 = inlined_call_operand.<no memory space> [shape: f32[1], index: 0, kind: input, shape index: {}]   ;;  %s1557_s1 = inlined_call_operand.vmem [shape: f32[256,128], index: 1, kind: input, shape index: {}]   ;;  %s1558_s2 = inlined_call_operand.vmem [shape: f32[128,128], index: 2, kind: input, shape index: {}]   ;;  %s1559_s3 = inlined_call_operand.vmem [shape: f32[1,128], index: 3, kind: input, shape index: {}]   ;;  %s1560_s4 = inlined_call_operand.vmem [shape: f32[128,128], index: 4, kind: input, shape index: {}]   ;;  %s1561_s5 = inlined_call_operand.vmem [shape: f32[1,128], index: 5, kind: input, shape index: {}]   ;;  %s1562_s6 = inlined_call_operand.vmem [shape: f32[256,128], index: 6, kind: output, shape index: {0}]   ;;  %s1563_s7 = inlined_call_operand.vmem [shape: f32[256,1], index: 7, kind: output, shape index: {1}]  }
   0x1   :  { %13 = sst [smem:[#allocation2]] %s1556_s0 }
   0x2 LB: > { %s917_s27 = sadd.s32 4294967295, %s1194_s26   ;;  %p921_p0 = scmp.ge.s32.totalorder %s1194_s26, 1  ;;  %s1194_s26 = sphi %s1239_s26, %s19_s26  }
   0x3   : > { %p242_p1 = scmp.lt.s32.totalorder %s1194_s26, 3 }
   0x5   : > { %p243_p2 = pnand %p921_p0, %p242_p1 }
   0x6   : > { %s297_s28 = sld [smem:[#allocation2]] (!%p243_p2)  ;;  %v345_v0 = vld [vmem:[%s1558_s2] sm:$0xff] (!%p243_p2)  ;;  %v346_v1 = vld [vmem:[%s1558_s2 + $0x8] sm:$0xff] (!%p243_p2)  ;;  %v347_v2 = vld [vmem:[%s1558_s2 + $0x10] sm:$0xff] (!%p243_p2)  ;;  %s922_s24 = sshll.u32 (!%p243_p2), %s917_s27, 4  ;;  %v323_v50 = vlaneseq (!%p243_p2)  ;;  %vm810_vm2 = vcmask (!%p243_p2), 7168  }
   0x7   : > { %246 = sbr.rel (%p243_p2) target bundleno = 763 (0x2fb), region = 44  ;;  %v1108_v3 = vpack.c.bf16 (!%p243_p2), %v346_v1, %v345_v0  ;;  %v348_v4 = vld [vmem:[%s1558_s2 + $0x18] sm:$0xff] (!%p243_p2)  ;;  %v349_v6 = vld [vmem:[%s1558_s2 + $0x20] sm:$0xff] (!%p243_p2)  ;;  %v350_v7 = vld [vmem:[%s1558_s2 + $0x28] sm:$0xff] (!%p243_p2)  ;;  %p280_p3 = scmp.lt.s32.totalorder (!%p243_p2), %s922_s24, 31 }
   0x8   : > { %v1112_v5 = vpack.c.bf16 (!%p243_p2), %v348_v4, %v347_v2  ;;  %v1116_v8 = vpack.c.bf16 (!%p243_p2), %v350_v7, %v349_v6  ;;  %v351_v9 = vld [vmem:[%s1558_s2 + $0x30] sm:$0xff] (!%p243_p2)  ;;  %v352_v10 = vld [vmem:[%s1558_s2 + $0x38] sm:$0xff] (!%p243_p2)  ;;  %v353_v14 = vld [vmem:[%s1558_s2 + $0x40] sm:$0xff] (!%p243_p2)  ;;  %v1341_v51 = vand.u32 (!%p243_p2), 127, %v323_v50 }
   0x9   : > { %1109 = vmatprep.subr.bf16.mxu0 (!%p243_p2), %v1108_v3  ;;  %v1120_v13 = vpack.c.bf16 (!%p243_p2), %v352_v10, %v351_v9  ;;  %v354_v15 = vld [vmem:[%s1558_s2 + $0x48] sm:$0xff] (!%p243_p2)  ;;  %v355_v17 = vld [vmem:[%s1558_s2 + $0x50] sm:$0xff] (!%p243_p2)  ;;  %v356_v18 = vld [vmem:[%s1558_s2 + $0x58] sm:$0xff] (!%p243_p2) }
   0xa   : > { %1111 = vmatpush3.bf16.msra.mxu0 (!%p243_p2), %v1108_v3  ;;  %v1124_v16 = vpack.c.bf16 (!%p243_p2), %v354_v15, %v353_v14  ;;  %v1128_v19 = vpack.c.bf16 (!%p243_p2), %v356_v18, %v355_v17  ;;  %v357_v20 = vld [vmem:[%s1558_s2 + $0x60] sm:$0xff] (!%p243_p2)  ;;  %v358_v21 = vld [vmem:[%s1558_s2 + $0x68] sm:$0xff] (!%p243_p2)  ;;  %v359_v24 = vld [vmem:[%s1558_s2 + $0x70] sm:$0xff] (!%p243_p2)  ;;  %vm325_vm0 = vcmp.lt.s32.totalorder (!%p243_p2), %v1341_v51, 64  ;;  %vm729_vm1 = vcmp.ge.s32.totalorder (!%p243_p2), %v1341_v51, 64 }
   0xb   : > { %1113 = vmatprep.subr.bf16.mxu0 (!%p243_p2), %v1112_v5  ;;  %v1132_v23 = vpack.c.bf16 (!%p243_p2), %v358_v21, %v357_v20  ;;  %v360_v25 = vld [vmem:[%s1558_s2 + $0x78] sm:$0xff] (!%p243_p2)  ;;  %v529_v27 = vld [vmem:[%s1560_s4] sm:$0xff] (!%p243_p2)  ;;  %v530_v28 = vld [vmem:[%s1560_s4 + $0x8] sm:$0xff] (!%p243_p2) }
   0xc   : > { %s298_s17 = ssub.f32 (!%p243_p2), 0.0, %s297_s28  ;;  %v1136_v26 = vpack.c.bf16 (!%p243_p2), %v360_v25, %v359_v24  ;;  %v531_v29 = vld [vmem:[%s1560_s4 + $0x10] sm:$0xff] (!%p243_p2)  ;;  %v1140_v30 = vpack.c.bf16 (!%p243_p2), %v530_v28, %v529_v27  ;;  %v532_v31 = vld [vmem:[%s1560_s4 + $0x18] sm:$0xff] (!%p243_p2)  ;;  %v533_v33 = vld [vmem:[%s1560_s4 + $0x20] sm:$0xff] (!%p243_p2) }
   0xd   : > { %v1144_v32 = vpack.c.bf16 (!%p243_p2), %v532_v31, %v531_v29  ;;  %v534_v34 = vld [vmem:[%s1560_s4 + $0x28] sm:$0xff] (!%p243_p2)  ;;  %v535_v36 = vld [vmem:[%s1560_s4 + $0x30] sm:$0xff] (!%p243_p2)  ;;  %v536_v37 = vld [vmem:[%s1560_s4 + $0x38] sm:$0xff] (!%p243_p2) }
   0xe   : > { %v299_v11 = vstv %s298_s17  ;;  %1115 = vmatpush3.bf16.msra.mxu0 %v1112_v5  ;;  %1141 = vmatprep.subr.bf16.mxu1 %v1140_v30  ;;  %v1148_v35 = vpack.c.bf16 %v534_v34, %v533_v33  ;;  %v1152_v38 = vpack.c.bf16 %v536_v37, %v535_v36  ;;  %v537_v39 = vld [vmem:[%s1560_s4 + $0x40] sm:$0xff]  ;;  %v538_v40 = vld [vmem:[%s1560_s4 + $0x48] sm:$0xff]  ;;  %v539_v42 = vld [vmem:[%s1560_s4 + $0x50] sm:$0xff]  ;;  %s1565_s24 = smov (!%p280_p3, %s922_s24), 31 }
   0xf   : > { %v300_v12 = vmul.f32 1.442695, %v299_v11  ;;  %1117 = vmatprep.subr.bf16.mxu0 %v1116_v8  ;;  %1143 = vmatpush3.bf16.msra.mxu1 %v1140_v30  ;;  %v1156_v41 = vpack.c.bf16 %v538_v40, %v537_v39  ;;  %v540_v43 = vld [vmem:[%s1560_s4 + $0x58] sm:$0xff]  ;;  %v541_v45 = vld [vmem:[%s1560_s4 + $0x60] sm:$0xff]  ;;  %v542_v46 = vld [vmem:[%s1560_s4 + $0x68] sm:$0xff]  ;;  %s1339_s25 = sshll.u32 %s1565_s24, 3 }
  0x10   : > { %1145 = vmatprep.subr.bf16.mxu1 %v1144_v32  ;;  %v1160_v44 = vpack.c.bf16 %v540_v43, %v539_v42  ;;  %v1164_v47 = vpack.c.bf16 %v542_v46, %v541_v45  ;;  %s1347_s30 = scalar_lea.vmem %s1557_s1, %s1339_s25  ;;  %v928_v25 = vld [vmem:[%s1559_s3] ss:$0 sm:$0xff]  ;;  %s1432_s18 = scalar_lea.vmem %s1562_s6, %s1339_s25 }
  0x11   : > { %1184 = vpow2.f32 %v300_v12  ;;  %v1351_v52 = vld [vmem:[%s1347_s30] sm:$0xff]  ;;  %v1354_v53 = vld [vmem:[%s1347_s30 + $0x8] sm:$0xff]  ;;  %v1357_v56 = vld [vmem:[%s1347_s30 + $0x10] sm:$0xff]  ;;  %s1519_s21 = scalar_lea.vmem %s1563_s7, %s1339_s25 }
  0x12   : > { %1119 = vmatpush3.bf16.msra.mxu0 %v1116_v8  ;;  %v1363_v60 = vld [vmem:[%s1347_s30 + $0x18] sm:$0xff]  ;;  %v1366_v61 = vld [vmem:[%s1347_s30 + $0x20] sm:$0xff]  ;;  %v1371_v0 = vld [vmem:[%s1347_s30 + $0x28] sm:$0xff] }
  0x13   : > { %1121 = vmatprep.subr.bf16.mxu0 %v1120_v13  ;;  %1147 = vmatpush3.bf16.msra.mxu1 %v1144_v32  ;;  %v1374_v1 = vld [vmem:[%s1347_s30 + $0x30] sm:$0xff]  ;;  %v1379_v4 = vld [vmem:[%s1347_s30 + $0x38] sm:$0xff]  ;;  %v1382_v5 = vld [vmem:[%s1347_s30 + $0x40] sm:$0xff] }
  0x14   : > { %1149 = vmatprep.subr.bf16.mxu1 %v1148_v35  ;;  %v1387_v8 = vld [vmem:[%s1347_s30 + $0x48] sm:$0xff]  ;;  %v1390_v9 = vld [vmem:[%s1347_s30 + $0x50] sm:$0xff]  ;;  %v1395_v12 = vld [vmem:[%s1347_s30 + $0x58] sm:$0xff] }
  0x15   : > { %v1406_v17 = vld [vmem:[%s1347_s30 + $0x70] sm:$0xff]  ;;  %v1411_v20 = vld [vmem:[%s1347_s30 + $0x78] sm:$0xff] }
  0x16   : > { %1123 = vmatpush3.bf16.msra.mxu0 %v1120_v13  ;;  %v1398_v13 = vld [vmem:[%s1347_s30 + $0x60] sm:$0xff] }
  0x17   : > { %1125 = vmatprep.subr.bf16.mxu0 %v1124_v16  ;;  %1151 = vmatpush3.bf16.msra.mxu1 %v1148_v35 }
  0x18   : > { %1153 = vmatprep.subr.bf16.mxu1 %v1152_v38 }
  0x1a   : > { %1127 = vmatpush3.bf16.msra.mxu0 %v1124_v16  ;;  %v1403_v16 = vld [vmem:[%s1347_s30 + $0x68] sm:$0xff] }
  0x1b   : > { %v1185_v22 = vpop.eup %1184  ;;  %1129 = vmatprep.subr.bf16.mxu0 %v1128_v19  ;;  %1155 = vmatpush3.bf16.msra.mxu1 %v1152_v38 }
  0x1c   : > { %1172 = vpush %v1185_v22  ;;  %1157 = vmatprep.subr.bf16.mxu1 %v1156_v41  ;;  %v543_v22 = vld [vmem:[%s1560_s4 + $0x70] sm:$0xff] }
  0x1e   : > { %1131 = vmatpush3.bf16.msra.mxu0 %v1128_v19 }
  0x1f   : > { %1133 = vmatprep.subr.bf16.mxu0 %v1132_v23  ;;  %1159 = vmatpush3.bf16.msra.mxu1 %v1156_v41 }
  0x20   : > { %1161 = vmatprep.subr.bf16.mxu1 %v1160_v44 }
  0x22   : > { %1135 = vmatpush3.bf16.msra.mxu0 %v1132_v23  ;;  %v544_v23 = vld [vmem:[%s1560_s4 + $0x78] sm:$0xff] }
  0x23   : > { %1137 = vmatprep.subr.bf16.mxu0 %v1136_v26  ;;  %1163 = vmatpush3.bf16.msra.mxu1 %v1160_v44  ;;  %v1168_v24 = vpack.c.bf16 %v544_v23, %v543_v22 }
  0x24   : > { %1165 = vmatprep.subr.bf16.mxu1 %v1164_v47 }
  0x26   : > { %1139 = vmatpush3.bf16.msra.mxu0 %v1136_v26 }
  0x27   : > { %1167 = vmatpush3.bf16.msra.mxu1 %v1164_v47 }
  0x28   : > { %1169 = vmatprep.subr.bf16.mxu1 %v1168_v24 }
  0x2b   : > { %1171 = vmatpush3.bf16.msra.mxu1 %v1168_v24 }
  0x4d   : > { %s1173_s22 = spop %1172 }
  0x4e   : > { %s303_s23 = sadd.f32 1.0, %s1173_s22 }
  0x50   : > { %v304_v48 = vstv %s303_s23 }
  0x51   : > { %1186 = vrcp.f32 %v304_v48 }
  0x5b   : > { %v1187_v49 = vpop.eup %1186 }
  0x5c   : > { %1174 = vpush %v1187_v49 }
  0x8d   : > { %s1175_s0 = spop %1174 }
  0x8e   : > { %s326_s27 = ssub.f32 1.0, %s1175_s0 }
  0x90   : > { %v327_v54 = vstv %s326_s27 }
  0x91   : > { %v328_v55 = vsel %vm325_vm0, %v327_v54, 1.0 }
  0x92   : > { %v329_v57 = vmul.f32 %v328_v55, %v1351_v52  ;;  %v330_v58 = vmul.f32 %v328_v55, %v1354_v53  ;;  %v331_v59 = vmul.f32 %v328_v55, %v1357_v56  ;;  %v332_v62 = vmul.f32 %v328_v55, %v1363_v60 }
  0x93   : > { %v333_v63 = vmul.f32 %v328_v55, %v1366_v61  ;;  %v334_v2 = vmul.f32 %v328_v55, %v1371_v0  ;;  %v335_v3 = vmul.f32 %v328_v55, %v1374_v1  ;;  %v336_v6 = vmul.f32 %v328_v55, %v1379_v4 }
  0x94   : > { %1028 = vmatprep.mubr.f32.mxu0 %v329_v57  ;;  %v337_v7 = vmul.f32 %v328_v55, %v1382_v5  ;;  %v338_v10 = vmul.f32 %v328_v55, %v1387_v8  ;;  %v339_v11 = vmul.f32 %v328_v55, %v1390_v9  ;;  %v340_v14 = vmul.f32 %v328_v55, %v1395_v12 }
  0x95   : > { %1029 = vmatmul.mubr.f32.vlgmr.msra.gmra.mrb[0].mxu0 %v330_v58  ;;  %v341_v15 = vmul.f32 %v328_v55, %v1398_v13  ;;  %v342_v18 = vmul.f32 %v328_v55, %v1403_v16  ;;  %v343_v19 = vmul.f32 %v328_v55, %v1406_v17  ;;  %v344_v21 = vmul.f32 %v328_v55, %v1411_v20 }
  0x96   : > { %1031 = vmatprep.mubr.f32.mxu0 %v331_v59 }
  0x99   : > { %1032 = vmatmul.mubr.f32.gmra.mrb[2].mxu0 %v332_v62 }
  0x9a   : > { %1034 = vmatprep.mubr.f32.mxu0 %v333_v63 }
  0x9d   : > { %1035 = vmatmul.mubr.f32.gmra.mrb[4].mxu0 %v334_v2 }
  0x9e   : > { %1037 = vmatprep.mubr.f32.mxu0 %v335_v3 }
  0xa1   : > { %1038 = vmatmul.mubr.f32.gmra.mrb[6].mxu0 %v336_v6 }
  0xa2   : > { %1040 = vmatprep.mubr.f32.mxu0 %v337_v7 }
  0xa5   : > { %1041 = vmatmul.mubr.f32.gmra.mrb[8].mxu0 %v338_v10 }
  0xa6   : > { %1043 = vmatprep.mubr.f32.mxu0 %v339_v11 }
  0xa9   : > { %1044 = vmatmul.mubr.f32.gmra.mrb[10].mxu0 %v340_v14 }
  0xaa   : > { %1046 = vmatprep.mubr.f32.mxu0 %v341_v15 }
  0xad   : > { %1047 = vmatmul.mubr.f32.gmra.mrb[12].mxu0 %v342_v18 }
  0xae   : > { %1049 = vmatprep.mubr.f32.mxu0 %v343_v19 }
  0xb1   : > { %1050 = vmatmul.mubr.f32.gmra.mrb[14].mxu0 %v344_v21 }
 0x168   : > { %v1030_v26 = vpop.f32.mrb[0].mxu0 }
 0x169   : > { %v440_v27 = vadd.f32 %v1030_v26, %v928_v25  ;;  %v434_v28 = vpop.f32.mrb[1].mxu0 }
 0x16a   : > { %v435_v29 = vadd.f32 %v928_v25, %v434_v28  ;;  %v1426_v28 = vld [vmem:[%s1561_s5] ss:$0 sm:$0xff] }
 0x16b   : > { %v514_v32 = vmax.f32 %v440_v27, 0.0 }
 0x16c   : > { %v1033_v30 = vpop.f32.mrb[2].mxu0  ;;  %v513_v31 = vmax.f32 %v435_v29, 0.0 }
 0x16d   : > { %v450_v33 = vadd.f32 %v1033_v30, %v928_v25  ;;  %v444_v34 = vpop.f32.mrb[3].mxu0 }
 0x16e   : > { %v445_v35 = vadd.f32 %v928_v25, %v444_v34  ;;  %1084 = vmatprep.mubr.f32.mxu1 %v513_v31 }
 0x16f   : > { %1085 = vmatmul.mubr.f32.vlgmr.msra.gmra.mrb[0].mxu1 %v514_v32  ;;  %v516_v38 = vmax.f32 %v450_v33, 0.0 }
 0x170   : > { %v515_v36 = vmax.f32 %v445_v35, 0.0  ;;  %v1036_v37 = vpop.f32.mrb[4].mxu0 }
 0x171   : > { %v460_v39 = vadd.f32 %v1036_v37, %v928_v25  ;;  %v454_v40 = vpop.f32.mrb[5].mxu0 }
 0x172   : > { %v455_v41 = vadd.f32 %v928_v25, %v454_v40  ;;  %1087 = vmatprep.mubr.f32.mxu1 %v515_v36 }
 0x173   : > { %1088 = vmatmul.mubr.f32.gmra.mrb[2].mxu1 %v516_v38  ;;  %v518_v44 = vmax.f32 %v460_v39, 0.0 }
 0x174   : > { %v517_v42 = vmax.f32 %v455_v41, 0.0  ;;  %v1039_v43 = vpop.f32.mrb[6].mxu0 }
 0x175   : > { %v470_v45 = vadd.f32 %v1039_v43, %v928_v25  ;;  %v464_v46 = vpop.f32.mrb[7].mxu0 }
 0x176   : > { %v465_v47 = vadd.f32 %v928_v25, %v464_v46  ;;  %1090 = vmatprep.mubr.f32.mxu1 %v517_v42 }
 0x177   : > { %1091 = vmatmul.mubr.f32.gmra.mrb[4].mxu1 %v518_v44  ;;  %v520_v50 = vmax.f32 %v470_v45, 0.0 }
 0x178   : > { %v519_v48 = vmax.f32 %v465_v47, 0.0  ;;  %v1042_v49 = vpop.f32.mrb[8].mxu0 }
 0x179   : > { %v480_v54 = vadd.f32 %v1042_v49, %v928_v25  ;;  %v474_v55 = vpop.f32.mrb[9].mxu0 }
 0x17a   : > { %v475_v57 = vadd.f32 %v928_v25, %v474_v55  ;;  %1093 = vmatprep.mubr.f32.mxu1 %v519_v48 }
 0x17b   : > { %1094 = vmatmul.mubr.f32.gmra.mrb[6].mxu1 %v520_v50  ;;  %v522_v62 = vmax.f32 %v480_v54, 0.0 }
 0x17c   : > { %v521_v58 = vmax.f32 %v475_v57, 0.0  ;;  %v1045_v59 = vpop.f32.mrb[10].mxu0 }
 0x17d   : > { %v490_v63 = vadd.f32 %v1045_v59, %v928_v25  ;;  %v484_v2 = vpop.f32.mrb[11].mxu0 }
 0x17e   : > { %v485_v3 = vadd.f32 %v928_v25, %v484_v2  ;;  %1096 = vmatprep.mubr.f32.mxu1 %v521_v58 }
 0x17f   : > { %1097 = vmatmul.mubr.f32.gmra.mrb[8].mxu1 %v522_v62  ;;  %v524_v10 = vmax.f32 %v490_v63, 0.0 }
 0x180   : > { %v523_v6 = vmax.f32 %v485_v3, 0.0  ;;  %v1048_v7 = vpop.f32.mrb[12].mxu0 }
 0x181   : > { %v500_v11 = vadd.f32 %v1048_v7, %v928_v25  ;;  %v494_v14 = vpop.f32.mrb[13].mxu0 }
 0x182   : > { %v495_v15 = vadd.f32 %v928_v25, %v494_v14  ;;  %1099 = vmatprep.mubr.f32.mxu1 %v523_v6 }
 0x183   : > { %1100 = vmatmul.mubr.f32.gmra.mrb[10].mxu1 %v524_v10  ;;  %v526_v21 = vmax.f32 %v500_v11, 0.0 }
 0x184   : > { %v525_v18 = vmax.f32 %v495_v15, 0.0  ;;  %v1051_v19 = vpop.f32.mrb[14].mxu0 }
 0x185   : > { %v510_v22 = vadd.f32 %v1051_v19, %v928_v25  ;;  %v504_v23 = vpop.f32.mrb[15].mxu0 }
 0x186   : > { %v505_v24 = vadd.f32 %v928_v25, %v504_v23  ;;  %1102 = vmatprep.mubr.f32.mxu1 %v525_v18 }
 0x187   : > { %1103 = vmatmul.mubr.f32.gmra.mrb[12].mxu1 %v526_v21  ;;  %v528_v27 = vmax.f32 %v510_v22, 0.0 }
 0x188   : > { %v527_v26 = vmax.f32 %v505_v24, 0.0 }
 0x18a   : > { %1105 = vmatprep.mubr.f32.mxu1 %v527_v26 }
 0x18b   : > { %1106 = vmatmul.mubr.f32.gmra.mrb[14].mxu1 %v528_v27 }
 0x242   : > { %v1086_v25 = vpop.f32.mrb[0].mxu1 }
 0x243   : > { %v624_v29 = vadd.f32 %v1086_v25, %v1426_v28  ;;  %v618_v30 = vpop.f32.mrb[1].mxu1 }
 0x244   : > { %v619_v31 = vadd.f32 %v1426_v28, %v618_v30 }
 0x245   : > { %698 = vst [vmem:[%s1432_s18 + $0x8] sm:$0xff] %v624_v29  ;;  %v714_v32 = vsub.f32 %v624_v29, %v1354_v53 }
 0x246   : > { %697 = vst [vmem:[%s1432_s18] sm:$0xff] %v619_v31  ;;  %v713_v33 = vsub.f32 %v619_v31, %v1351_v52  ;;  %v1089_v34 = vpop.f32.mrb[2].mxu1 }
 0x247   : > { %v634_v35 = vadd.f32 %v1089_v34, %v1426_v28  ;;  %v628_v36 = vpop.f32.mrb[3].mxu1  ;;  %v731_v37 = vmul.f32 %v714_v32, %v714_v32 }
 0x248   : > { %v629_v38 = vadd.f32 %v1426_v28, %v628_v36  ;;  %v730_v39 = vmul.f32 %v713_v33, %v713_v33 }
 0x249   : > { %700 = vst [vmem:[%s1432_s18 + $0x18] sm:$0xff] %v634_v35  ;;  %v747_v40 = vsel %vm729_vm1, %v731_v37, 0.0  ;;  %v716_v53 = vsub.f32 %v634_v35, %v1363_v60 }
 0x24a   : > { %699 = vst [vmem:[%s1432_s18 + $0x10] sm:$0xff] %v629_v38  ;;  %v715_v41 = vsub.f32 %v629_v38, %v1357_v56  ;;  %764 = vadd.xlane.f32.xlu0 %v747_v40  ;;  %v1092_v52 = vpop.f32.mrb[4].mxu1  ;;  %v746_v42 = vsel %vm729_vm1, %v730_v39, 0.0 }
 0x24b   : > { %v644_v43 = vadd.f32 %v1092_v52, %v1426_v28  ;;  %v638_v44 = vpop.f32.mrb[5].mxu1  ;;  %v733_v45 = vmul.f32 %v716_v53, %v716_v53 }
 0x24c   : > { %v639_v46 = vadd.f32 %v1426_v28, %v638_v44  ;;  %v732_v47 = vmul.f32 %v715_v41, %v715_v41 }
 0x24d   : > { %702 = vst [vmem:[%s1432_s18 + $0x28] sm:$0xff] %v644_v43  ;;  %v718_v48 = vsub.f32 %v644_v43, %v1371_v0  ;;  %v749_v56 = vsel %vm729_vm1, %v733_v45, 0.0 }
 0x24e   : > { %701 = vst [vmem:[%s1432_s18 + $0x20] sm:$0xff] %v639_v46  ;;  %v717_v60 = vsub.f32 %v639_v46, %v1366_v61  ;;  %768 = vadd.xlane.f32.xlu1 %v749_v56  ;;  %v1095_v49 = vpop.f32.mrb[6].mxu1  ;;  %762 = vadd.xlane.f32.xlu0 %v746_v42  ;;  %v748_v50 = vsel %vm729_vm1, %v732_v47, 0.0 }
 0x24f   : > { %v654_v54 = vadd.f32 %v1095_v49, %v1426_v28  ;;  %v648_v55 = vpop.f32.mrb[7].mxu1  ;;  %v735_v57 = vmul.f32 %v718_v48, %v718_v48 }
 0x250   : > { %v649_v58 = vadd.f32 %v1426_v28, %v648_v55  ;;  %v734_v0 = vmul.f32 %v717_v60, %v717_v60 }
 0x251   : > { %704 = vst [vmem:[%s1432_s18 + $0x38] sm:$0xff] %v654_v54  ;;  %v720_v59 = vsub.f32 %v654_v54, %v1379_v4  ;;  %v751_v61 = vsel %vm729_vm1, %v735_v57, 0.0 }
 0x252   : > { %703 = vst [vmem:[%s1432_s18 + $0x30] sm:$0xff] %v649_v58  ;;  %v719_v62 = vsub.f32 %v649_v58, %v1374_v1  ;;  %v1098_v63 = vpop.f32.mrb[8].mxu1  ;;  %766 = vadd.xlane.f32.xlu1 %v748_v50  ;;  %v750_v2 = vsel %vm729_vm1, %v734_v0, 0.0 }
 0x253   : > { %v664_v3 = vadd.f32 %v1098_v63, %v1426_v28  ;;  %v658_v6 = vpop.f32.mrb[9].mxu1  ;;  %770 = vadd.xlane.f32.xlu0 %v750_v2  ;;  %v737_v7 = vmul.f32 %v720_v59, %v720_v59 }
 0x254   : > { %v659_v10 = vadd.f32 %v1426_v28, %v658_v6  ;;  %v736_v4 = vmul.f32 %v719_v62, %v719_v62 }
 0x255   : > { %706 = vst [vmem:[%s1432_s18 + $0x48] sm:$0xff] %v664_v3  ;;  %v722_v11 = vsub.f32 %v664_v3, %v1387_v8  ;;  %v753_v1 = vsel %vm729_vm1, %v737_v7, 0.0 }
 0x256   : > { %705 = vst [vmem:[%s1432_s18 + $0x40] sm:$0xff] %v659_v10  ;;  %v721_v14 = vsub.f32 %v659_v10, %v1382_v5  ;;  %v1101_v15 = vpop.f32.mrb[10].mxu1  ;;  %772 = vadd.xlane.f32.xlu1 %v751_v61  ;;  %v752_v18 = vsel %vm729_vm1, %v736_v4, 0.0 }
 0x257   : > { %v674_v19 = vadd.f32 %v1101_v15, %v1426_v28  ;;  %v668_v21 = vpop.f32.mrb[11].mxu1  ;;  %774 = vadd.xlane.f32.xlu0 %v752_v18  ;;  %v739_v22 = vmul.f32 %v722_v11, %v722_v11 }
 0x258   : > { %v669_v23 = vadd.f32 %v1426_v28, %v668_v21  ;;  %v738_v8 = vmul.f32 %v721_v14, %v721_v14 }
 0x259   : > { %708 = vst [vmem:[%s1432_s18 + $0x58] sm:$0xff] %v674_v19  ;;  %v724_v24 = vsub.f32 %v674_v19, %v1395_v12  ;;  %v755_v5 = vsel %vm729_vm1, %v739_v22, 0.0 }
 0x25a   : > { %707 = vst [vmem:[%s1432_s18 + $0x50] sm:$0xff] %v669_v23  ;;  %v723_v26 = vsub.f32 %v669_v23, %v1390_v9  ;;  %v1104_v27 = vpop.f32.mrb[12].mxu1  ;;  %776 = vadd.xlane.f32.xlu1 %v753_v1  ;;  %v754_v25 = vsel %vm729_vm1, %v738_v8, 0.0 }
 0x25b   : > { %v684_v29 = vadd.f32 %v1104_v27, %v1426_v28  ;;  %v678_v30 = vpop.f32.mrb[13].mxu1  ;;  %778 = vadd.xlane.f32.xlu0 %v754_v25  ;;  %v741_v31 = vmul.f32 %v724_v24, %v724_v24 }
 0x25c   : > { %v679_v32 = vadd.f32 %v1426_v28, %v678_v30  ;;  %v740_v12 = vmul.f32 %v723_v26, %v723_v26 }
 0x25d   : > { %710 = vst [vmem:[%s1432_s18 + $0x68] sm:$0xff] %v684_v29  ;;  %v726_v33 = vsub.f32 %v684_v29, %v1403_v16  ;;  %v757_v9 = vsel %vm729_vm1, %v741_v31, 0.0 }
 0x25e   : > { %709 = vst [vmem:[%s1432_s18 + $0x60] sm:$0xff] %v679_v32  ;;  %v725_v34 = vsub.f32 %v679_v32, %v1398_v13  ;;  %v1107_v35 = vpop.f32.mrb[14].mxu1  ;;  %780 = vadd.xlane.f32.xlu1 %v755_v5  ;;  %v756_v36 = vsel %vm729_vm1, %v740_v12, 0.0 }
 0x25f   : > { %v694_v37 = vadd.f32 %v1107_v35, %v1426_v28  ;;  %v688_v38 = vpop.f32.mrb[15].mxu1  ;;  %782 = vadd.xlane.f32.xlu0 %v756_v36  ;;  %v743_v39 = vmul.f32 %v726_v33, %v726_v33 }
 0x260   : > { %v689_v40 = vadd.f32 %v1426_v28, %v688_v38  ;;  %v742_v16 = vmul.f32 %v725_v34, %v725_v34 }
 0x261   : > { %712 = vst [vmem:[%s1432_s18 + $0x78] sm:$0xff] %v694_v37  ;;  %v728_v53 = vsub.f32 %v694_v37, %v1411_v20  ;;  %v759_v13 = vsel %vm729_vm1, %v743_v39, 0.0 }
 0x262   : > { %711 = vst [vmem:[%s1432_s18 + $0x70] sm:$0xff] %v689_v40  ;;  %v727_v41 = vsub.f32 %v689_v40, %v1406_v17  ;;  %784 = vadd.xlane.f32.xlu1 %v757_v9  ;;  %v758_v52 = vsel %vm729_vm1, %v742_v16, 0.0 }
 0x263   : > { %786 = vadd.xlane.f32.xlu0 %v758_v52  ;;  %v745_v42 = vmul.f32 %v728_v53, %v728_v53 }
 0x264   : > { %v744_v43 = vmul.f32 %v727_v41, %v727_v41 }
 0x265   : > { %v761_v28 = vsel %vm729_vm1, %v745_v42, 0.0 }
 0x266   : > { %788 = vadd.xlane.f32.xlu1 %v759_v13  ;;  %v760_v20 = vsel %vm729_vm1, %v744_v43, 0.0 }
 0x267   : > { %790 = vadd.xlane.f32.xlu0 %v760_v20 }
 0x26a   : > { %792 = vadd.xlane.f32.xlu1 %v761_v28 }
 0x2d7   : > { %v765_v17 = vpop.xlane.xlu0 %764 }
 0x2d8   : > { %v795_v44 = vmul.f32 0.015625, %v765_v17 }
 0x2da   : > { %812 = vst.msk [vmem:[%s1519_s21 + $0x8] sm:$0xff] %vm810_vm2, %v795_v44 }
 0x2db   : > { %v769_v45 = vpop.xlane.xlu1 %768  ;;  %v763_v51 = vpop.xlane.xlu0 %762 }
 0x2dc   : > { %v797_v46 = vmul.f32 0.015625, %v769_v45  ;;  %v794_v47 = vmul.f32 0.015625, %v763_v51 }
 0x2de   : > { %814 = vst.msk [vmem:[%s1519_s21 + $0x18] sm:$0xff] %vm810_vm2, %v797_v46  ;;  %811 = vst.msk [vmem:[%s1519_s21] sm:$0xff] %vm810_vm2, %v794_v47 }
 0x2df   : > { %v767_v48 = vpop.xlane.xlu1 %766 }
 0x2e0   : > { %v796_v56 = vmul.f32 0.015625, %v767_v48  ;;  %v771_v60 = vpop.xlane.xlu0 %770 }
 0x2e1   : > { %v798_v49 = vmul.f32 0.015625, %v771_v60 }
 0x2e2   : > { %813 = vst.msk [vmem:[%s1519_s21 + $0x10] sm:$0xff] %vm810_vm2, %v796_v56 }
 0x2e3   : > { %815 = vst.msk [vmem:[%s1519_s21 + $0x20] sm:$0xff] %vm810_vm2, %v798_v49  ;;  %v773_v50 = vpop.xlane.xlu1 %772 }
 0x2e4   : > { %v799_v54 = vmul.f32 0.015625, %v773_v50  ;;  %v775_v55 = vpop.xlane.xlu0 %774 }
 0x2e5   : > { %v800_v57 = vmul.f32 0.015625, %v775_v55 }
 0x2e6   : > { %816 = vst.msk [vmem:[%s1519_s21 + $0x28] sm:$0xff] %vm810_vm2, %v799_v54 }
 0x2e7   : > { %817 = vst.msk [vmem:[%s1519_s21 + $0x30] sm:$0xff] %vm810_vm2, %v800_v57  ;;  %v777_v58 = vpop.xlane.xlu1 %776 }
 0x2e8   : > { %v801_v0 = vmul.f32 0.015625, %v777_v58  ;;  %v779_v59 = vpop.xlane.xlu0 %778 }
 0x2e9   : > { %v802_v61 = vmul.f32 0.015625, %v779_v59 }
 0x2ea   : > { %818 = vst.msk [vmem:[%s1519_s21 + $0x38] sm:$0xff] %vm810_vm2, %v801_v0 }
 0x2eb   : > { %819 = vst.msk [vmem:[%s1519_s21 + $0x40] sm:$0xff] %vm810_vm2, %v802_v61  ;;  %v781_v62 = vpop.xlane.xlu1 %780 }
 0x2ec   : > { %v803_v63 = vmul.f32 0.015625, %v781_v62  ;;  %v783_v2 = vpop.xlane.xlu0 %782 }
 0x2ed   : > { %v804_v3 = vmul.f32 0.015625, %v783_v2 }
 0x2ee   : > { %820 = vst.msk [vmem:[%s1519_s21 + $0x48] sm:$0xff] %vm810_vm2, %v803_v63 }
 0x2ef   : > { %821 = vst.msk [vmem:[%s1519_s21 + $0x50] sm:$0xff] %vm810_vm2, %v804_v3  ;;  %v785_v6 = vpop.xlane.xlu1 %784 }
 0x2f0   : > { %v805_v7 = vmul.f32 0.015625, %v785_v6  ;;  %v787_v10 = vpop.xlane.xlu0 %786 }
 0x2f1   : > { %v806_v4 = vmul.f32 0.015625, %v787_v10 }
 0x2f2   : > { %822 = vst.msk [vmem:[%s1519_s21 + $0x58] sm:$0xff] %vm810_vm2, %v805_v7 }
 0x2f3   : > { %823 = vst.msk [vmem:[%s1519_s21 + $0x60] sm:$0xff] %vm810_vm2, %v806_v4  ;;  %v789_v11 = vpop.xlane.xlu1 %788 }
 0x2f4   : > { %v807_v1 = vmul.f32 0.015625, %v789_v11  ;;  %v791_v14 = vpop.xlane.xlu0 %790 }
 0x2f5   : > { %v808_v15 = vmul.f32 0.015625, %v791_v14 }
 0x2f6   : > { %824 = vst.msk [vmem:[%s1519_s21 + $0x68] sm:$0xff] %vm810_vm2, %v807_v1 }
 0x2f7   : > { %825 = vst.msk [vmem:[%s1519_s21 + $0x70] sm:$0xff] %vm810_vm2, %v808_v15  ;;  %v793_v18 = vpop.xlane.xlu1 %792 }
 0x2f8   : > { %v809_v19 = vmul.f32 0.015625, %v793_v18 }
 0x2fa   : > { %826 = vst.msk [vmem:[%s1519_s21 + $0x78] sm:$0xff] %vm810_vm2, %v809_v19 }
 0x2fb PF: > { %s19_s26 = sadd.s32 1, %s1194_s26  }
 0x2fc   : > { %p16_p4 = scmp.ge.s32.totalorder %s19_s26, 4  }
 0x2fe   :  { %18 = sbr.rel (!%p16_p4) target bundleno = 2 (0x2), region = 86 }

</bundles_post_ra>
